<compile_context>
chip_gen: v7x
topology: tpu7x:2x2x1
jax: 0.10.0
libtpu: 0.0.40
codegen_flags: <defaults>
</compile_context>

<pallas_src>
import functools

import jax
import jax.numpy as jnp
from jax import lax
from jax.experimental import pallas as pl
from jax.experimental.pallas import tpu as pltpu


# ----------------------------------------------------------------------------
# Fused Pallas kernel: linear -> [conv1d + bias + relu + transpose(1,2)] * N
# ----------------------------------------------------------------------------
def _text_encoder_fused_kernel(x_ref, bw_ref, bb_ref, *refs, conv_shapes, max_pad):
    # refs = (w_taps_0, b_0, w_taps_1, b_1, ..., o_ref, pad_scratch)
    o_ref, pad_ref = refs[-2], refs[-1]
    conv_refs = refs[:-2]
    n_layers = len(conv_shapes)

    bt, L, E = x_ref.shape
    H = bw_ref.shape[1]

    # ---- BERT stand-in: one batched (bt*L, E) @ (E, H) MXU matmul ----
    h = jnp.dot(x_ref[...].reshape(bt * L, E), bw_ref[...],
                preferred_element_type=jnp.float32) + bb_ref[...]
    # (length, channels) layout per sample == text_output.transpose(1, 2) of the module.
    act = h.reshape(bt, L, H)

    for li, (ksize, c_in, c_out) in enumerate(conv_shapes):
        w_ref = conv_refs[2 * li]        # (K, C_in, C_out), MXU-canonical RHS per tap
        b_ref = conv_refs[2 * li + 1]    # (1, C_out)
        pad = ksize // 2
        cur_len = act.shape[1]
        l_out = cur_len + 2 * pad - ksize + 1
        lo = max_pad - pad               # scratch row holding conceptual padded row 0

        # Zero the (tiny) pad borders, then write the activation interior into the
        # persistent padded scratch: no concatenates, no fresh padded buffers.
        if pad > 0:
            zeros = jnp.zeros((bt, pad, c_in), jnp.float32)
            pad_ref[:, lo:max_pad, :c_in] = zeros
            pad_ref[:, max_pad + cur_len:max_pad + cur_len + pad, :c_in] = zeros
        pad_ref[:, max_pad:max_pad + cur_len, :c_in] = act

        # K canonical per-tap matmuls, batched over the batch tile, f32 accumulation:
        #   y[t, co] = sum_k sum_ci X_pad[t+k, ci] * w[co, ci, k]
        y = jnp.zeros((bt * l_out, c_out), jnp.float32)
        for k in range(ksize):
            slab = pad_ref[:, lo + k:lo + k + l_out, :c_in].reshape(bt * l_out, c_in)
            y = y + jnp.dot(slab, w_ref[k], preferred_element_type=jnp.float32)

        # Bias + ReLU once per layer (single broadcast, single select).
        y = jnp.maximum(y + b_ref[...], 0.0).reshape(bt, l_out, c_out)

        if li == n_layers - 1:
            # (bt, l_out, C_out) is already the module's final transpose(1, 2) layout.
            o_ref[...] = y.astype(o_ref.dtype)
        else:
            # transpose(1, 2): the next layer consumes (length=C_out, channels=l_out).
            act = jnp.transpose(y, (0, 2, 1))


# ----------------------------------------------------------------------------
# One-time parameter relayout (hoisted out of the per-call path)
# ----------------------------------------------------------------------------
def prepare_params(params, kernel_sizes):
    conv_ops = []
    for (w, b), ks in zip(params["convs"], kernel_sizes):
        c_out, c_in, k = w.shape
        assert k == ks
        # w_taps[k, ci, co] = w[co, ci, k]: each tap is an MXU-canonical (C_in, C_out) RHS.
        conv_ops.append((jnp.transpose(w, (2, 1, 0)), b.reshape(1, c_out)))
    return {
        "bert_w": params["bert_w"],
        "bert_b": params["bert_b"].reshape(1, -1),
        "convs": conv_ops,
    }


# ----------------------------------------------------------------------------
# TextEncoder forward (matches the PyTorch module semantics)
# ----------------------------------------------------------------------------
def text_encoder_forward(inputs, seq_lens, prep, kernel_sizes, batch_tile=None):
    # inputs: (B, max_len, embedding_dim); seq_lens unused (faithful to the PyTorch forward).
    del seq_lens
    assert len(kernel_sizes) >= 1
    B, L, E = inputs.shape
    H = prep["bert_w"].shape[1]

    # Static per-layer shapes implied by the module's transpose-then-conv loop.
    conv_shapes, in_lens, in_chs = [], [], []
    cur_len, cur_ch = L, H
    out_len = out_ch = None
    for (w_taps, _), ks in zip(prep["convs"], kernel_sizes):
        k, c_in, c_out = w_taps.shape
        assert k == ks
        assert c_in == cur_ch, (
            "Conv in_channels mismatch: the module's transpose-then-conv loop requires "
            "hidden_dimension == max_len (== num_kernel for deeper stacks).")
        conv_shapes.append((ks, c_in, c_out))
        in_lens.append(cur_len)
        in_chs.append(c_in)
        l_out = cur_len + 2 * (ks // 2) - ks + 1
        out_len, out_ch = l_out, c_out
        cur_len, cur_ch = c_out, l_out            # effect of transpose(1, 2)

    max_pad = max(ks // 2 for ks in kernel_sizes)
    len_max, ch_max = max(in_lens), max(in_chs)

    # Batch tiling: >= 2 parallel grid points when B >= 2 (v7x has 2 TensorCores),
    # while keeping matmul M = bt * l_out as large as possible within each tile.
    if batch_tile is None:
        batch_tile = max(1, B // 2)
        if B % batch_tile:
            batch_tile = 1
    bt = batch_tile
    assert B % bt == 0
    grid = (B // bt,)

    flat_conv_args = [a for pair in prep["convs"] for a in pair]
    args = [inputs, prep["bert_w"], prep["bert_b"], *flat_conv_args]

    kernel = functools.partial(
        _text_encoder_fused_kernel, conv_shapes=tuple(conv_shapes), max_pad=max_pad)

    def replicated(arr):
        nd = arr.ndim
        return pl.BlockSpec(arr.shape, lambda i, _nd=nd: (0,) * _nd)

    # Advisory cost estimate so XLA schedules surrounding ops sensibly.
    flops = 2 * B * L * E * H + sum(
        2 * B * (ln + 2 * (ks // 2) - ks + 1) * ks * ci * co
        for (ks, ci, co), ln in zip(conv_shapes, in_lens))
    bytes_accessed = 4 * (B * L * E + E * H + H
                          + sum(ks * ci * co + co for ks, ci, co in conv_shapes)
                          + B * out_len * out_ch)

    out = pl.pallas_call(
        kernel,
        out_shape=jax.ShapeDtypeStruct((B, out_len, out_ch), inputs.dtype),
        grid=grid,
        in_specs=[pl.BlockSpec((bt, L, E), lambda i: (i, 0, 0)),
                  replicated(prep["bert_w"]),
                  replicated(prep["bert_b"]),
                  *[replicated(a) for a in flat_conv_args]],
        out_specs=pl.BlockSpec((bt, out_len, out_ch), lambda i: (i, 0, 0)),
        scratch_shapes=[pltpu.VMEM((bt, len_max + 2 * max_pad, ch_max), jnp.float32)],
        compiler_params=pltpu.CompilerParams(dimension_semantics=("parallel",)),
        cost_estimate=pl.CostEstimate(flops=flops, transcendentals=0,
                                      bytes_accessed=bytes_accessed),
    )(*args)
    return out


def text_encoder_reference(inputs, params, kernel_sizes):
    """Plain-JAX reference for numerical checking."""
    last_hidden = jnp.einsum("ble,eh->blh", inputs, params["bert_w"]) + params["bert_b"]
    text_output = jnp.transpose(last_hidden, (0, 2, 1))
    for (w, b), ks in zip(params["convs"], kernel_sizes):
        pad = ks // 2
        y = lax.conv_general_dilated(
            text_output, w, window_strides=(1,), padding=[(pad, pad)],
            dimension_numbers=("NCH", "OIH", "NCH"),
        ) + b.reshape(1, -1, 1)
        text_output = jnp.transpose(jnp.maximum(y, 0.0), (0, 2, 1))
    return text_output


# ----------------------------------------------------------------------------
# Main
# ----------------------------------------------------------------------------
if __name__ == "__main__":
    # Small shapes consistent with the module. hidden == max_len == num_kernel is
    # required by the original forward's transpose-then-conv loop.
    B = 4
    MAX_LEN = 32
    EMB_DIM = 32
    HIDDEN = 32
    NUM_KERNEL = 32
    KERNEL_SIZES = (3, 5)

    key = jax.random.PRNGKey(0)
    k_in, k_bw, k_bb, *k_convs = jax.random.split(key, 3 + 2 * len(KERNEL_SIZES))

    inputs = jax.random.normal(k_in, (B, MAX_LEN, EMB_DIM), dtype=jnp.float32)
    seq_lens = jnp.full((B, MAX_LEN), MAX_LEN, dtype=jnp.int32)

    params = {
        "bert_w": 0.1 * jax.random.normal(k_bw, (EMB_DIM, HIDDEN), dtype=jnp.float32),
        "bert_b": 0.01 * jax.random.normal(k_bb, (HIDDEN,), dtype=jnp.float32),
        "convs": [],
    }
    for li, ks in enumerate(KERNEL_SIZES):
        kw, kb = k_convs[2 * li], k_convs[2 * li + 1]
        w = 0.1 * jax.random.normal(kw, (NUM_KERNEL, HIDDEN, ks), dtype=jnp.float32)
        b = 0.01 * jax.random.normal(kb, (NUM_KERNEL,), dtype=jnp.float32)
        params["convs"].append((w, b))

    # One-time weight relayout + jitted forward (no per-call transpose/pad/reshape dispatches).
    prep = prepare_params(params, KERNEL_SIZES)
    fwd = jax.jit(functools.partial(text_encoder_forward, kernel_sizes=tuple(KERNEL_SIZES)))

    out = jax.block_until_ready(fwd(inputs, seq_lens, prep))

    ref = text_encoder_reference(inputs, params, KERNEL_SIZES)
    assert out.shape == ref.shape, (out.shape, ref.shape)
    max_err = float(jnp.max(jnp.abs(out - ref)))
    assert jnp.allclose(out, ref, atol=5e-4, rtol=5e-4), max_err

    print("KERNEL_OK")
</pallas_src>

<mosaic_0001>
module attributes {stable_mosaic.version = 11 : i64} {
  func.func @_text_encoder_fused_kernel(%arg0: i32, %arg1: memref<2x32x32xf32, #tpu.memory_space<vmem>>, %arg2: memref<32x32xf32, #tpu.memory_space<vmem>>, %arg3: memref<1x32xf32, #tpu.memory_space<vmem>>, %arg4: memref<3x32x32xf32, #tpu.memory_space<vmem>>, %arg5: memref<1x32xf32, #tpu.memory_space<vmem>>, %arg6: memref<5x32x32xf32, #tpu.memory_space<vmem>>, %arg7: memref<1x32xf32, #tpu.memory_space<vmem>>, %arg8: memref<2x32x32xf32, #tpu.memory_space<vmem>>, %arg9: memref<2x36x32xf32, #tpu.memory_space<vmem>>) attributes {dimension_semantics = [#tpu.dimension_semantics<parallel>], iteration_bounds = array<i64: 2>, scalar_prefetch = 0 : i64, scratch_operands = 1 : i64, tpu.core_type = #tpu.core_type<tc>, window_params = [{transform_indices = @transform_0, window_bounds = array<i64: 2, 32, 32>}, {pipeline_mode = #tpu.pipeline_mode<synchronous>, transform_indices = @transform_1, window_bounds = array<i64: 32, 32>}, {pipeline_mode = #tpu.pipeline_mode<synchronous>, transform_indices = @transform_2, window_bounds = array<i64: 1, 32>}, {pipeline_mode = #tpu.pipeline_mode<synchronous>, transform_indices = @transform_3, window_bounds = array<i64: 3, 32, 32>}, {pipeline_mode = #tpu.pipeline_mode<synchronous>, transform_indices = @transform_4, window_bounds = array<i64: 1, 32>}, {pipeline_mode = #tpu.pipeline_mode<synchronous>, transform_indices = @transform_5, window_bounds = array<i64: 5, 32, 32>}, {pipeline_mode = #tpu.pipeline_mode<synchronous>, transform_indices = @transform_6, window_bounds = array<i64: 1, 32>}, {transform_indices = @transform_7, window_bounds = array<i64: 2, 32, 32>}]} {
    %c0 = arith.constant 0 : index
    %c0_0 = arith.constant 0 : index
    %c0_1 = arith.constant 0 : index
    %0 = vector.load %arg1[%c0, %c0_0, %c0_1] : memref<2x32x32xf32, #tpu.memory_space<vmem>>, vector<2x32x32xf32>
    %1 = vector.shape_cast %0 : vector<2x32x32xf32> to vector<64x32xf32>
    %c0_2 = arith.constant 0 : index
    %c0_3 = arith.constant 0 : index
    %2 = vector.load %arg2[%c0_2, %c0_3] : memref<32x32xf32, #tpu.memory_space<vmem>>, vector<32x32xf32>
    %cst = arith.constant dense<0.000000e+00> : vector<64x32xf32>
    %3 = tpu.matmul %1, %2, %cst {dimension_numbers = #tpu.dot_dimension_numbers<[1], [0], [0], [1], [0, 0, 1, 1], [], []>} : vector<64x32xf32>, vector<32x32xf32>, vector<64x32xf32> -> vector<64x32xf32>
    %c0_4 = arith.constant 0 : index
    %c0_5 = arith.constant 0 : index
    %4 = vector.load %arg3[%c0_4, %c0_5] : memref<1x32xf32, #tpu.memory_space<vmem>>, vector<1x32xf32>
    %5 = vector.broadcast %4 : vector<1x32xf32> to vector<64x32xf32>
    %6 = arith.addf %3, %5 : vector<64x32xf32>
    %7 = vector.shape_cast %6 : vector<64x32xf32> to vector<2x32x32xf32>
    %cst_6 = arith.constant 0.000000e+00 : f32
    %8 = vector.broadcast %cst_6 : f32 to vector<2x1x32xf32>
    %c0_7 = arith.constant 0 : index
    %c1 = arith.constant 1 : index
    %c0_8 = arith.constant 0 : index
    %9 = vector.load %arg9[%c0_7, %c1, %c0_8] : memref<2x36x32xf32, #tpu.memory_space<vmem>>, vector<2x1x32xf32>
    tpu.vector_store %arg9[%c0_7, %c1, %c0_8], %8 {strides = array<i32>} : memref<2x36x32xf32, #tpu.memory_space<vmem>>, vector<2x1x32xf32>,
    %c0_9 = arith.constant 0 : index
    %c34 = arith.constant 34 : index
    %c0_10 = arith.constant 0 : index
    %10 = vector.load %arg9[%c0_9, %c34, %c0_10] : memref<2x36x32xf32, #tpu.memory_space<vmem>>, vector<2x1x32xf32>
    tpu.vector_store %arg9[%c0_9, %c34, %c0_10], %8 {strides = array<i32>} : memref<2x36x32xf32, #tpu.memory_space<vmem>>, vector<2x1x32xf32>,
    %c0_11 = arith.constant 0 : index
    %c2 = arith.constant 2 : index
    %c0_12 = arith.constant 0 : index
    %11 = vector.load %arg9[%c0_11, %c2, %c0_12] : memref<2x36x32xf32, #tpu.memory_space<vmem>>, vector<2x32x32xf32>
    tpu.vector_store %arg9[%c0_11, %c2, %c0_12], %7 {strides = array<i32>} : memref<2x36x32xf32, #tpu.memory_space<vmem>>, vector<2x32x32xf32>,
    %cst_13 = arith.constant 0.000000e+00 : f32
    %12 = vector.broadcast %cst_13 : f32 to vector<64x32xf32>
    %c0_14 = arith.constant 0 : index
    %c1_15 = arith.constant 1 : index
    %c0_16 = arith.constant 0 : index
    %13 = vector.load %arg9[%c0_14, %c1_15, %c0_16] : memref<2x36x32xf32, #tpu.memory_space<vmem>>, vector<2x32x32xf32>
    %14 = vector.shape_cast %13 : vector<2x32x32xf32> to vector<64x32xf32>
    %c0_17 = arith.constant 0 : index
    %c0_18 = arith.constant 0 : index
    %c0_19 = arith.constant 0 : index
    %15 = vector.load %arg4[%c0_17, %c0_18, %c0_19] : memref<3x32x32xf32, #tpu.memory_space<vmem>>, vector<1x32x32xf32>
    %16 = vector.shape_cast %15 : vector<1x32x32xf32> to vector<32x32xf32>
    %cst_20 = arith.constant dense<0.000000e+00> : vector<64x32xf32>
    %17 = tpu.matmul %14, %16, %cst_20 {dimension_numbers = #tpu.dot_dimension_numbers<[1], [0], [0], [1], [0, 0, 1, 1], [], []>} : vector<64x32xf32>, vector<32x32xf32>, vector<64x32xf32> -> vector<64x32xf32>
    %18 = arith.addf %12, %17 : vector<64x32xf32>
    %c0_21 = arith.constant 0 : index
    %c2_22 = arith.constant 2 : index
    %c0_23 = arith.constant 0 : index
    %19 = vector.load %arg9[%c0_21, %c2_22, %c0_23] : memref<2x36x32xf32, #tpu.memory_space<vmem>>, vector<2x32x32xf32>
    %20 = vector.shape_cast %19 : vector<2x32x32xf32> to vector<64x32xf32>
    %c1_24 = arith.constant 1 : index
    %c0_25 = arith.constant 0 : index
    %c0_26 = arith.constant 0 : index
    %21 = vector.load %arg4[%c1_24, %c0_25, %c0_26] : memref<3x32x32xf32, #tpu.memory_space<vmem>>, vector<1x32x32xf32>
    %22 = vector.shape_cast %21 : vector<1x32x32xf32> to vector<32x32xf32>
    %cst_27 = arith.constant dense<0.000000e+00> : vector<64x32xf32>
    %23 = tpu.matmul %20, %22, %cst_27 {dimension_numbers = #tpu.dot_dimension_numbers<[1], [0], [0], [1], [0, 0, 1, 1], [], []>} : vector<64x32xf32>, vector<32x32xf32>, vector<64x32xf32> -> vector<64x32xf32>
    %24 = arith.addf %18, %23 : vector<64x32xf32>
    %c0_28 = arith.constant 0 : index
    %c3 = arith.constant 3 : index
    %c0_29 = arith.constant 0 : index
    %25 = vector.load %arg9[%c0_28, %c3, %c0_29] : memref<2x36x32xf32, #tpu.memory_space<vmem>>, vector<2x32x32xf32>
    %26 = vector.shape_cast %25 : vector<2x32x32xf32> to vector<64x32xf32>
    %c2_30 = arith.constant 2 : index
    %c0_31 = arith.constant 0 : index
    %c0_32 = arith.constant 0 : index
    %27 = vector.load %arg4[%c2_30, %c0_31, %c0_32] : memref<3x32x32xf32, #tpu.memory_space<vmem>>, vector<1x32x32xf32>
    %28 = vector.shape_cast %27 : vector<1x32x32xf32> to vector<32x32xf32>
    %cst_33 = arith.constant dense<0.000000e+00> : vector<64x32xf32>
    %29 = tpu.matmul %26, %28, %cst_33 {dimension_numbers = #tpu.dot_dimension_numbers<[1], [0], [0], [1], [0, 0, 1, 1], [], []>} : vector<64x32xf32>, vector<32x32xf32>, vector<64x32xf32> -> vector<64x32xf32>
    %30 = arith.addf %24, %29 : vector<64x32xf32>
    %c0_34 = arith.constant 0 : index
    %c0_35 = arith.constant 0 : index
    %31 = vector.load %arg5[%c0_34, %c0_35] : memref<1x32xf32, #tpu.memory_space<vmem>>, vector<1x32xf32>
    %32 = vector.broadcast %31 : vector<1x32xf32> to vector<64x32xf32>
    %33 = arith.addf %30, %32 : vector<64x32xf32>
    %cst_36 = arith.constant 0.000000e+00 : f32
    %34 = vector.broadcast %cst_36 : f32 to vector<64x32xf32>
    %35 = arith.maximumf %33, %34 : vector<64x32xf32>
    %36 = vector.shape_cast %35 : vector<64x32xf32> to vector<2x32x32xf32>
    %37 = tpu.transpose %36, [0, 2, 1] : vector<2x32x32xf32> -> vector<2x32x32xf32>
    %cst_37 = arith.constant 0.000000e+00 : f32
    %38 = vector.broadcast %cst_37 : f32 to vector<2x2x32xf32>
    %c0_38 = arith.constant 0 : index
    %c0_39 = arith.constant 0 : index
    %c0_40 = arith.constant 0 : index
    %39 = vector.load %arg9[%c0_38, %c0_39, %c0_40] : memref<2x36x32xf32, #tpu.memory_space<vmem>>, vector<2x2x32xf32>
    tpu.vector_store %arg9[%c0_38, %c0_39, %c0_40], %38 {strides = array<i32>} : memref<2x36x32xf32, #tpu.memory_space<vmem>>, vector<2x2x32xf32>,
    %c0_41 = arith.constant 0 : index
    %c34_42 = arith.constant 34 : index
    %c0_43 = arith.constant 0 : index
    %40 = vector.load %arg9[%c0_41, %c34_42, %c0_43] : memref<2x36x32xf32, #tpu.memory_space<vmem>>, vector<2x2x32xf32>
    tpu.vector_store %arg9[%c0_41, %c34_42, %c0_43], %38 {strides = array<i32>} : memref<2x36x32xf32, #tpu.memory_space<vmem>>, vector<2x2x32xf32>,
    %c0_44 = arith.constant 0 : index
    %c2_45 = arith.constant 2 : index
    %c0_46 = arith.constant 0 : index
    %41 = vector.load %arg9[%c0_44, %c2_45, %c0_46] : memref<2x36x32xf32, #tpu.memory_space<vmem>>, vector<2x32x32xf32>
    tpu.vector_store %arg9[%c0_44, %c2_45, %c0_46], %37 {strides = array<i32>} : memref<2x36x32xf32, #tpu.memory_space<vmem>>, vector<2x32x32xf32>,
    %cst_47 = arith.constant 0.000000e+00 : f32
    %42 = vector.broadcast %cst_47 : f32 to vector<64x32xf32>
    %c0_48 = arith.constant 0 : index
    %c0_49 = arith.constant 0 : index
    %c0_50 = arith.constant 0 : index
    %43 = vector.load %arg9[%c0_48, %c0_49, %c0_50] : memref<2x36x32xf32, #tpu.memory_space<vmem>>, vector<2x32x32xf32>
    %44 = vector.shape_cast %43 : vector<2x32x32xf32> to vector<64x32xf32>
    %c0_51 = arith.constant 0 : index
    %c0_52 = arith.constant 0 : index
    %c0_53 = arith.constant 0 : index
    %45 = vector.load %arg6[%c0_51, %c0_52, %c0_53] : memref<5x32x32xf32, #tpu.memory_space<vmem>>, vector<1x32x32xf32>
    %46 = vector.shape_cast %45 : vector<1x32x32xf32> to vector<32x32xf32>
    %cst_54 = arith.constant dense<0.000000e+00> : vector<64x32xf32>
    %47 = tpu.matmul %44, %46, %cst_54 {dimension_numbers = #tpu.dot_dimension_numbers<[1], [0], [0], [1], [0, 0, 1, 1], [], []>} : vector<64x32xf32>, vector<32x32xf32>, vector<64x32xf32> -> vector<64x32xf32>
    %48 = arith.addf %42, %47 : vector<64x32xf32>
    %c0_55 = arith.constant 0 : index
    %c1_56 = arith.constant 1 : index
    %c0_57 = arith.constant 0 : index
    %49 = vector.load %arg9[%c0_55, %c1_56, %c0_57] : memref<2x36x32xf32, #tpu.memory_space<vmem>>, vector<2x32x32xf32>
    %50 = vector.shape_cast %49 : vector<2x32x32xf32> to vector<64x32xf32>
    %c1_58 = arith.constant 1 : index
    %c0_59 = arith.constant 0 : index
    %c0_60 = arith.constant 0 : index
    %51 = vector.load %arg6[%c1_58, %c0_59, %c0_60] : memref<5x32x32xf32, #tpu.memory_space<vmem>>, vector<1x32x32xf32>
    %52 = vector.shape_cast %51 : vector<1x32x32xf32> to vector<32x32xf32>
    %cst_61 = arith.constant dense<0.000000e+00> : vector<64x32xf32>
    %53 = tpu.matmul %50, %52, %cst_61 {dimension_numbers = #tpu.dot_dimension_numbers<[1], [0], [0], [1], [0, 0, 1, 1], [], []>} : vector<64x32xf32>, vector<32x32xf32>, vector<64x32xf32> -> vector<64x32xf32>
    %54 = arith.addf %48, %53 : vector<64x32xf32>
    %c0_62 = arith.constant 0 : index
    %c2_63 = arith.constant 2 : index
    %c0_64 = arith.constant 0 : index
    %55 = vector.load %arg9[%c0_62, %c2_63, %c0_64] : memref<2x36x32xf32, #tpu.memory_space<vmem>>, vector<2x32x32xf32>
    %56 = vector.shape_cast %55 : vector<2x32x32xf32> to vector<64x32xf32>
    %c2_65 = arith.constant 2 : index
    %c0_66 = arith.constant 0 : index
    %c0_67 = arith.constant 0 : index
    %57 = vector.load %arg6[%c2_65, %c0_66, %c0_67] : memref<5x32x32xf32, #tpu.memory_space<vmem>>, vector<1x32x32xf32>
    %58 = vector.shape_cast %57 : vector<1x32x32xf32> to vector<32x32xf32>
    %cst_68 = arith.constant dense<0.000000e+00> : vector<64x32xf32>
    %59 = tpu.matmul %56, %58, %cst_68 {dimension_numbers = #tpu.dot_dimension_numbers<[1], [0], [0], [1], [0, 0, 1, 1], [], []>} : vector<64x32xf32>, vector<32x32xf32>, vector<64x32xf32> -> vector<64x32xf32>
    %60 = arith.addf %54, %59 : vector<64x32xf32>
    %c0_69 = arith.constant 0 : index
    %c3_70 = arith.constant 3 : index
    %c0_71 = arith.constant 0 : index
    %61 = vector.load %arg9[%c0_69, %c3_70, %c0_71] : memref<2x36x32xf32, #tpu.memory_space<vmem>>, vector<2x32x32xf32>
    %62 = vector.shape_cast %61 : vector<2x32x32xf32> to vector<64x32xf32>
    %c3_72 = arith.constant 3 : index
    %c0_73 = arith.constant 0 : index
    %c0_74 = arith.constant 0 : index
    %63 = vector.load %arg6[%c3_72, %c0_73, %c0_74] : memref<5x32x32xf32, #tpu.memory_space<vmem>>, vector<1x32x32xf32>
    %64 = vector.shape_cast %63 : vector<1x32x32xf32> to vector<32x32xf32>
    %cst_75 = arith.constant dense<0.000000e+00> : vector<64x32xf32>
    %65 = tpu.matmul %62, %64, %cst_75 {dimension_numbers = #tpu.dot_dimension_numbers<[1], [0], [0], [1], [0, 0, 1, 1], [], []>} : vector<64x32xf32>, vector<32x32xf32>, vector<64x32xf32> -> vector<64x32xf32>
    %66 = arith.addf %60, %65 : vector<64x32xf32>
    %c0_76 = arith.constant 0 : index
    %c4 = arith.constant 4 : index
    %c0_77 = arith.constant 0 : index
    %67 = vector.load %arg9[%c0_76, %c4, %c0_77] : memref<2x36x32xf32, #tpu.memory_space<vmem>>, vector<2x32x32xf32>
    %68 = vector.shape_cast %67 : vector<2x32x32xf32> to vector<64x32xf32>
    %c4_78 = arith.constant 4 : index
    %c0_79 = arith.constant 0 : index
    %c0_80 = arith.constant 0 : index
    %69 = vector.load %arg6[%c4_78, %c0_79, %c0_80] : memref<5x32x32xf32, #tpu.memory_space<vmem>>, vector<1x32x32xf32>
    %70 = vector.shape_cast %69 : vector<1x32x32xf32> to vector<32x32xf32>
    %cst_81 = arith.constant dense<0.000000e+00> : vector<64x32xf32>
    %71 = tpu.matmul %68, %70, %cst_81 {dimension_numbers = #tpu.dot_dimension_numbers<[1], [0], [0], [1], [0, 0, 1, 1], [], []>} : vector<64x32xf32>, vector<32x32xf32>, vector<64x32xf32> -> vector<64x32xf32>
    %72 = arith.addf %66, %71 : vector<64x32xf32>
    %c0_82 = arith.constant 0 : index
    %c0_83 = arith.constant 0 : index
    %73 = vector.load %arg7[%c0_82, %c0_83] : memref<1x32xf32, #tpu.memory_space<vmem>>, vector<1x32xf32>
    %74 = vector.broadcast %73 : vector<1x32xf32> to vector<64x32xf32>
    %75 = arith.addf %72, %74 : vector<64x32xf32>
    %cst_84 = arith.constant 0.000000e+00 : f32
    %76 = vector.broadcast %cst_84 : f32 to vector<64x32xf32>
    %77 = arith.maximumf %75, %76 : vector<64x32xf32>
    %78 = vector.shape_cast %77 : vector<64x32xf32> to vector<2x32x32xf32>
    %c0_85 = arith.constant 0 : index
    %c0_86 = arith.constant 0 : index
    %c0_87 = arith.constant 0 : index
    %79 = vector.load %arg8[%c0_85, %c0_86, %c0_87] : memref<2x32x32xf32, #tpu.memory_space<vmem>>, vector<2x32x32xf32>
    tpu.vector_store %arg8[%c0_85, %c0_86, %c0_87], %78 {strides = array<i32>} : memref<2x32x32xf32, #tpu.memory_space<vmem>>, vector<2x32x32xf32>,
    return
  }
  func.func @transform_0(%arg0: i32) -> (i32, i32, i32) {
    %c0_i32 = arith.constant 0 : i32
    %c0_i32_0 = arith.constant 0 : i32
    %c0_i32_1 = arith.constant 0 : i32
    return %arg0, %c0_i32, %c0_i32_0 : i32, i32, i32
  }
  func.func @transform_1(%arg0: i32) -> (i32, i32) {
    %c0_i32 = arith.constant 0 : i32
    %c0_i32_0 = arith.constant 0 : i32
    %c0_i32_1 = arith.constant 0 : i32
    return %c0_i32, %c0_i32_0 : i32, i32
  }
  func.func @transform_2(%arg0: i32) -> (i32, i32) {
    %c0_i32 = arith.constant 0 : i32
    %c0_i32_0 = arith.constant 0 : i32
    %c0_i32_1 = arith.constant 0 : i32
    return %c0_i32, %c0_i32_0 : i32, i32
  }
  func.func @transform_3(%arg0: i32) -> (i32, i32, i32) {
    %c0_i32 = arith.constant 0 : i32
    %c0_i32_0 = arith.constant 0 : i32
    %c0_i32_1 = arith.constant 0 : i32
    %c0_i32_2 = arith.constant 0 : i32
    return %c0_i32, %c0_i32_0, %c0_i32_1 : i32, i32, i32
  }
  func.func @transform_4(%arg0: i32) -> (i32, i32) {
    %c0_i32 = arith.constant 0 : i32
    %c0_i32_0 = arith.constant 0 : i32
    %c0_i32_1 = arith.constant 0 : i32
    return %c0_i32, %c0_i32_0 : i32, i32
  }
  func.func @transform_5(%arg0: i32) -> (i32, i32, i32) {
    %c0_i32 = arith.constant 0 : i32
    %c0_i32_0 = arith.constant 0 : i32
    %c0_i32_1 = arith.constant 0 : i32
    %c0_i32_2 = arith.constant 0 : i32
    return %c0_i32, %c0_i32_0, %c0_i32_1 : i32, i32, i32
  }
  func.func @transform_6(%arg0: i32) -> (i32, i32) {
    %c0_i32 = arith.constant 0 : i32
    %c0_i32_0 = arith.constant 0 : i32
    %c0_i32_1 = arith.constant 0 : i32
    return %c0_i32, %c0_i32_0 : i32, i32
  }
  func.func @transform_7(%arg0: i32) -> (i32, i32, i32) {
    %c0_i32 = arith.constant 0 : i32
    %c0_i32_0 = arith.constant 0 : i32
    %c0_i32_1 = arith.constant 0 : i32
    return %arg0, %c0_i32, %c0_i32_0 : i32, i32, i32
  }
}

</mosaic_0001>

<bundles_post_ra>
// kernel: text_encoder_forward.1
= control target key start
LH: loop header
LB: loop body
LE: loop exit
PB: predicated region body
PF: predicated region fallthrough
CT: control target
= control target key end

     0   :  { %12 = vsyncpa [#allocation4], 0  ;;  %s3168_s0 = inlined_call_operand.hbm [shape: f32[4,32,32], index: 0, kind: input, shape index: {}]   ;;  %s3169_s1 = inlined_call_operand.hbm [shape: f32[32,32], index: 1, kind: input, shape index: {}]   ;;  %s3170_s2 = inlined_call_operand.vmem [shape: f32[1,32], index: 2, kind: input, shape index: {}]   ;;  %s3171_s3 = inlined_call_operand.hbm [shape: f32[3,32,32], index: 3, kind: input, shape index: {}]   ;;  %s3172_s4 = inlined_call_operand.vmem [shape: f32[1,32], index: 4, kind: input, shape index: {}]   ;;  %s3173_s5 = inlined_call_operand.hbm [shape: f32[5,32,32], index: 5, kind: input, shape index: {}]   ;;  %s3174_s6 = inlined_call_operand.vmem [shape: f32[1,32], index: 6, kind: input, shape index: {}]   ;;  %s3175_s7 = inlined_call_operand.hbm [shape: f32[4,32,32], index: 7, kind: output, shape index: {}]  }
   0x1   :  { %14 = vsyncpa [#allocation4 + $0x1], 0 }
   0x2   :  { %15 = vsyncpa [#allocation7], 0 }
   0x3   :  { %16 = vsyncpa [#allocation10], 0 }
   0x4   :  { %17 = vsyncpa [#allocation5], 0 }
   0x5   :  { %19 = vsyncpa [#allocation5 + $0x1], 0  ;;  %s2755_s24 = smov 0   ;;  %s2757_s25 = smov 0  }
   0x6   :  { %s2759_s26 = smov 0   ;;  %s2761_s27 = smov 0  }
   0x7 LB: > { %s2776_s28 = sadd.s32 4294967295, %s2703_s27   ;;  %s1920_s29 = sadd.s32 4294967294, %s2703_s27   ;;  %s2703_s27 = sphi %s2761_s27, %s3201_s27   ;;  %s2699_s26 = sphi %s2759_s26, %s3200_s26   ;;  %s2695_s25 = sphi %s2757_s25, %s3199_s25   ;;  %s2691_s24 = sphi %s2755_s24, %s3198_s24  }
   0x8   : > { %p45_p0 = scmp.ne.s32.totalorder %s2695_s25, %s2691_s24  ;;  %p3176_p1 = scmp.eq.s32.totalorder %s2776_s28, 0 }
   0x9   : > { %p201_p3 = scmp.eq.s32.totalorder %s1920_s29, 1  ;;  %p1921_p5 = scmp.ge.s32.totalorder %s2703_s27, 1 }
   0xa   : > { %p2785_p4 = por %p3176_p1, %p45_p0  ;;  %p208_p7 = scmp.lt.s32.totalorder %s2703_s27, 3 }
   0xb   : > { %p2790_p6 = por %p201_p3, %p45_p0  ;;  %s2705_s10 = smov [#allocation6]  }
   0xc   : > { %s3180_s30 = scalar_select %p2785_p4, 1, 0 }
   0xd   : > { %s3181_s8 = scalar_select %p2790_p6, 1, 0 }
   0xe   : > { %p2795_p8 = pnand %p1921_p5, %p208_p7  ;;  %s220_s11 = sshll.u32 %s2705_s10, 4  ;;  %s2799_s11 = int_to_ptr.vmem [resolvable:$true] %s220_s11 }
   0xf   : > { %3182 = sst [smem:[#allocation16_spill]] %s3181_s8  ;;  %s2706_s13 = smov [#allocation8]  }
  0x10   : > { %s3183_s9 = scalar_select %p2795_p8, 1, 0 }
  0x11   : > { %p2449_p9 = pneg %p2795_p8  ;;  %s236_s14 = sshll.u32 %s2706_s13, 4  ;;  %s2810_s14 = int_to_ptr.vmem [resolvable:$true] %s236_s14 }
  0x12   : > { %s2707_s15 = smov [#allocation9]   ;;  %s2515_s19 = scalar_lea.hbm %s3169_s1, 512 }
  0x13   : > { %p2806_p11 = pnand %p2449_p9, %p3176_p1  ;;  %s2812_s16 = sshll.u32 %s2707_s15, 4  ;;  %s253_s16 = int_to_ptr.vmem [resolvable:$true] %s2812_s16 }
  0x14   : > { %p2516_p12 = scmp.ne.s32.totalorder %s3169_s1, %s2515_s19  ;;  %p2522_p5 = scmp.lt.u32.totalorder %s2515_s19, %s3169_s1 }
  0x15   : > { %p2822_p13 = pneg %p2806_p11 }
  0x17   : > { %p2518_p0 = pnand %p2822_p13, %p2516_p12 }
  0x19   : > { %p2519_p3 = pneg %p2518_p0 }
  0x1b   : > { %p2524_p7 = pnand %p2522_p5, %p2519_p3 }
  0x1d   : > { %2527 = shalt.err (!%p2524_p7)
}
  0x1e   : > { %s2528_s10 = scalar_lea.vmem %s2799_s11, 512  ;;  %p2536_p2 = scmp.lt.s32.totalorder %s2799_s11, %s2799_s11 }
  0x1f   : > { %p2529_p9 = scmp.ne.s32.totalorder %s2799_s11, %s2528_s10  ;;  %p2537_p6 = scmp.lt.s32.totalorder %s2528_s10, %s2528_s10 }
  0x21   : > { %p2531_p10 = pnand %p2529_p9, %p2822_p13  ;;  %p2538_p12 = por %p2537_p6, %p2536_p2 }
  0x23   : > { %p2532_p1 = pneg %p2531_p10 }
  0x25   : > { %p2539_p0 = pnand %p2538_p12, %p2532_p1 }
  0x27   : > { %2542 = shalt.err (!%p2539_p0)
}
  0x28   : > { %s2708_s13 = smov 128   ;;  %s2709_s15 = smov 8  }
  0x29   : > { %2452 = dma.hbm_to_vmem [thread:$0]  (!%p2806_p11), %s3169_s1, 512, %s2799_s11, [#allocation7], %s2708_s13, %s2708_s13, %s2709_s15  }
  0x2a   : > { %s2543_s21 = scalar_lea.hbm %s3171_s3, 1536 }
  0x2b   : > { %p2544_p1 = scmp.ne.s32.totalorder %s3171_s3, %s2543_s21  ;;  %p2550_p10 = scmp.lt.u32.totalorder %s2543_s21, %s3171_s3 }
  0x2d   : > { %p2546_p2 = pnand %p2544_p1, %p2822_p13 }
  0x2f   : > { %p2547_p6 = pneg %p2546_p2 }
  0x31   : > { %p2552_p3 = pnand %p2550_p10, %p2547_p6 }
  0x33   : > { %2555 = shalt.err (!%p2552_p3)
}
  0x34   : > { %s2556_s11 = scalar_lea.vmem %s2810_s14, 1536  ;;  %p2564_p12 = scmp.lt.s32.totalorder %s2810_s14, %s2810_s14 }
  0x35   : > { %p2557_p5 = scmp.ne.s32.totalorder %s2810_s14, %s2556_s11  ;;  %p2565_p0 = scmp.lt.s32.totalorder %s2556_s11, %s2556_s11 }
  0x37   : > { %p2559_p7 = pnand %p2557_p5, %p2822_p13  ;;  %p2566_p1 = por %p2565_p0, %p2564_p12 }
  0x39   : > { %p2560_p9 = pneg %p2559_p7 }
  0x3b   : > { %p2567_p2 = pnand %p2566_p1, %p2560_p9 }
  0x3d   : > { %2570 = shalt.err (!%p2567_p2)
}
  0x3e   : > { %2455 = dma.hbm_to_vmem [thread:$0]  (!%p2806_p11), %s3171_s3, 1536, %s2810_s14, [#allocation7], %s2708_s13, %s2708_s13, %s2709_s15  }
  0x3f   : > { %s2571_s20 = scalar_lea.hbm %s3173_s5, 2560 }
  0x40   : > { %p2572_p6 = scmp.ne.s32.totalorder %s3173_s5, %s2571_s20  ;;  %p2578_p5 = scmp.lt.u32.totalorder %s2571_s20, %s3173_s5 }
  0x42   : > { %p2574_p10 = pnand %p2572_p6, %p2822_p13 }
  0x44   : > { %p2575_p3 = pneg %p2574_p10 }
  0x46   : > { %p2580_p7 = pnand %p2578_p5, %p2575_p3 }
  0x48   : > { %2583 = shalt.err (!%p2580_p7)
}
  0x49   : > { %s2584_s11 = scalar_lea.vmem %s253_s16, 2560  ;;  %p2592_p1 = scmp.lt.s32.totalorder %s253_s16, %s253_s16 }
  0x4a   : > { %p2585_p9 = scmp.ne.s32.totalorder %s253_s16, %s2584_s11  ;;  %p2593_p2 = scmp.lt.s32.totalorder %s2584_s11, %s2584_s11 }
  0x4c   : > { %p2587_p12 = pnand %p2585_p9, %p2822_p13  ;;  %p2594_p4 = por %p2593_p2, %p2592_p1 }
  0x4e   : > { %p2588_p0 = pneg %p2587_p12 }
  0x50   : > { %p2595_p8 = pnand %p2594_p4, %p2588_p0 }
  0x52   : > { %2598 = shalt.err (!%p2595_p8)
}
  0x53   : > { %2458 = dma.hbm_to_vmem [thread:$0]  (!%p2806_p11), %s3173_s5, 2560, %s253_s16, [#allocation10], %s2708_s13, %s2708_s13, %s2709_s15  }
  0x54   : > { %s2895_s22 = sadd.s32 1, %s2703_s27   ;;  %s32_s17 = sadd.s32 1, %s2699_s26 }
  0x55   : > { %s29_s12 = ssub.s32 %s2703_s27, %s2895_s22  ;;  %p39_p8 = scmp.ne.s32.totalorder %s2699_s26, %s2695_s25 }
  0x56   : > { %p30_p4 = scmp.eq.s32.totalorder %s29_s12, 0  ;;  %p40_p13 = scmp.eq.s32.totalorder %s2703_s27, 0 }
  0x57   : > { %p2470_p6 = scmp.lt.s32.totalorder %s2703_s27, 2  ;;  %p3186_p3 = scmp.eq.s32.totalorder %s2776_s28, 1 }
  0x58   : > { %s2905_s18 = scalar_select %p30_p4, %s2699_s26, %s32_s17  }
  0x59   : > { %p41_p10 = por %p40_p13, %p39_p8  ;;  %p2909_p5 = por %p3186_p3, %p39_p8 }
  0x5a   : > { %s269_s20 = sand.u32 1, %s2699_s26   ;;  %s2018_s21 = sshll.u32 %s2703_s27, 10 }
  0x5b   : > { %s1926_s16 = sshll.u32 %s269_s20, 6  ;;  %s2918_s10 = scalar_lea.hbm %s3168_s0, %s2018_s21 }
  0x5c   : > { %s273_s11 = scalar_lea.vmem [#allocation3], %s1926_s16  ;;  %p2920_p11 = pnand %p2470_p6, %p41_p10 }
  0x5d   : > { %s281_s14 = sshll.u32 %s273_s11, 4  ;;  %s2926_s12 = scalar_lea.sflag [#allocation4], %s269_s20  ;;  %s2924_s14 = int_to_ptr.vmem [resolvable:$true] %s281_s14 }
  0x5e   : > { %s2599_s17 = scalar_lea.hbm %s2918_s10, 1024  ;;  %p2601_p9 = pneg %p2920_p11 }
  0x5f   : > { %p2600_p7 = scmp.ne.s32.totalorder %s2918_s10, %s2599_s17  ;;  %s2604_s23 = scalar_lea.hbm %s3168_s0, 2048 }
  0x60   : > { %p2605_p1 = scmp.lt.u32.totalorder %s2918_s10, %s3168_s0  ;;  %p2606_p2 = scmp.lt.u32.totalorder %s2604_s23, %s2599_s17 }
  0x61   : > { %p2602_p12 = pnand %p2601_p9, %p2600_p7  ;;  %p2608_p8 = scmp.lt.u32.totalorder %s2599_s17, %s2918_s10 }
  0x62   : > { %p2607_p4 = por %p2606_p2, %p2605_p1 }
  0x63   : > { %p2603_p0 = pneg %p2602_p12 }
  0x64   : > { %p2609_p13 = por %p2608_p8, %p2607_p4 }
  0x66   : > { %p2610_p6 = pnand %p2609_p13, %p2603_p0 }
  0x68   : > { %2613 = shalt.err (!%p2610_p6)
}
  0x69   : > { %s2614_s20 = scalar_lea.vmem %s2924_s14, 1024  ;;  %s2710_s21 = smov [#allocation3]  }
  0x6a   : > { %p2615_p10 = scmp.ne.s32.totalorder %s2924_s14, %s2614_s20  ;;  %s2619_s16 = sshll.u32 %s2710_s21, 4  ;;  %s2620_s16 = int_to_ptr.vmem [resolvable:$false] %s2619_s16 }
  0x6b   : > { %s2621_s29 = scalar_lea.vmem %s2620_s16, 2048  ;;  %p2622_p12 = scmp.lt.s32.totalorder %s2924_s14, %s2620_s16 }
  0x6c   : > { %p2617_p3 = pnand %p2615_p10, %p2601_p9  ;;  %p2623_p1 = scmp.lt.s32.totalorder %s2621_s29, %s2614_s20 }
  0x6e   : > { %p2618_p7 = pneg %p2617_p3  ;;  %p2624_p2 = por %p2623_p1, %p2622_p12 }
  0x70   : > { %p2625_p4 = pnand %p2624_p2, %p2618_p7 }
  0x72   : > { %2628 = shalt.err (!%p2625_p4)
}
  0x73   : > { %2462 = dma.hbm_to_vmem [thread:$0]  (!%p2920_p11), %s2918_s10, 1024, %s2924_s14, %s2926_s12, %s2708_s13, %s2708_s13, %s2709_s15  }
  0x74   : > { %p3189_p9 = scmp.ne.s32.totalorder %s3183_s9, 0 }
  0x75   : > { %s2960_s17 = sand.u32 (!%p3189_p9), 1, %s2695_s25   ;;  %p3190_p0 = scmp.ne.s32.totalorder (!%p3189_p9), %s3180_s30, 0 }
  0x76   : > { %293 = sbr.rel (%p3189_p9) target bundleno = 1065 (0x429), region = 48  ;;  %s1931_s23 = sshll.u32 (!%p3189_p9), %s2960_s17, 6 }
  0x77   : > { %s296_s11 = scalar_lea.sflag (!%p3189_p9), [#allocation4], %s2960_s17  ;;  %s2966_s8 = scalar_lea.vmem (!%p3189_p9), [#allocation3], %s1931_s23 }
  0x7d   : > { %2674 = dma.done.wait (%p3190_p0), %s296_s11, 1024  }
  0x7e   : > { %2676 = vsyncadd (%p3190_p0), %s296_s11, 4294966272  ;;  %p3191_p11 = scmp.eq.s32.totalorder %s2776_s28, 0 }
  0x80   : > { %2678 = dma.done.wait (%p3191_p11), [#allocation7], 2048   ;;  %p3192_p8 = pmov %p3191_p11 }
  0x82   : > { %2680 = vsyncadd (%p3192_p8), [#allocation7], 4294965248  ;;  %p3193_p13 = pmov %p3192_p8 }
  0x83   : > { %p3194_p6 = pmov %p3192_p8 }
  0x84   : > { %2682 = dma.done.wait (%p3193_p13), [#allocation10], 2560  }
  0x85   : > { %2684 = vsyncadd (%p3194_p6), [#allocation10], 4294964736  ;;  %vm363_vm0 = vcmask 261120   ;;  %v352_v0 = vld [vmem:[#allocation6] sm:$0xff]  ;;  %v353_v1 = vld [vmem:[#allocation6 + $0x8] sm:$0xff]  ;;  %vm493_vm1 = vcmask 253952  }
  0x86   : > { %v354_v2 = vld [vmem:[#allocation6 + $0x10] sm:$0xff]  ;;  %v2309_v3 = vpack.c.bf16 %v353_v1, %v352_v0  ;;  %v355_v4 = vld [vmem:[#allocation6 + $0x18] sm:$0xff]  ;;  %v344_v5 = vld [vmem:[%s2966_s8] sm:$0xff]  ;;  %v2711_v17 = vmov 0.0   ;;  %vm1026_vm2 = vcmask 254976   ;;  %s3099_s12 = scalar_lea.vmem [#allocation11], %s1931_s23 }
  0x87   : > { %v2313_v6 = vpack.c.bf16 %v355_v4, %v354_v2  ;;  %2137 = vmatprep.mubr.msk.f32.mxu1 %vm363_vm0, %v344_v5  ;;  %v527_v7 = vld [vmem:[#allocation8 + $0x20] sm:$0xff]  ;;  %v528_v8 = vld [vmem:[#allocation8 + $0x28] sm:$0xff]  ;;  %v346_v11 = vld [vmem:[%s2966_s8 + $0x10] sm:$0xff]  ;;  %494 = vst.msk [vmem:[#allocation2 + $0x1] sm:$0x1] %vm493_vm1, %v2711_v17  ;;  %s2020_s20 = sshll.u32 %s2776_s28, 10 }
  0x88   : > { %2310 = vmatprep.subr.bf16.mxu1 %v2309_v3  ;;  %v2317_v9 = vpack.c.bf16 %v528_v8, %v527_v7  ;;  %v345_v10 = vld [vmem:[%s2966_s8 + $0x8] sm:$0xff]  ;;  %v347_v12 = vld [vmem:[%s2966_s8 + $0x18] sm:$0xff]  ;;  %v348_v13 = vld [vmem:[%s2966_s8 + $0x20] sm:$0xff]  ;;  %495 = vst.msk [vmem:[#allocation2 + $0x29] sm:$0x1] %vm493_vm1, %v2711_v17  ;;  %s1818_s21 = sshll.u32 %s3099_s12, 4  ;;  %s3118_s23 = scalar_lea.hbm %s3175_s7, %s2020_s20  ;;  %s3120_s21 = int_to_ptr.vmem [resolvable:$true] %s1818_s21 }
  0x89   : > { %2312 = vmatpush3.bf16.msra.mxu1 %v2309_v3  ;;  %v349_v14 = vld [vmem:[%s2966_s8 + $0x28] sm:$0xff]  ;;  %v350_v15 = vld [vmem:[%s2966_s8 + $0x30] sm:$0xff]  ;;  %v351_v16 = vld [vmem:[%s2966_s8 + $0x38] sm:$0xff]  ;;  %496 = vst.msk [vmem:[#allocation2 + $0x22] sm:$0x1] %vm493_vm1, %v2711_v17  ;;  %s1804_s28 = scalar_lea.sflag [#allocation5], %s2960_s17 }
  0x8a   : > { %2314 = vmatprep.subr.bf16.mxu1 %v2313_v6  ;;  %497 = vst.msk [vmem:[#allocation2 + $0x4a] sm:$0x1] %vm493_vm1, %v2711_v17  ;;  %v529_v18 = vld [vmem:[#allocation8 + $0x30] sm:$0xff]  ;;  %v530_v19 = vld [vmem:[#allocation8 + $0x38] sm:$0xff]  ;;  %v514_v21 = vld [vmem:[#allocation8] sm:$0xff]  ;;  %s2629_s11 = scalar_lea.vmem %s3120_s21, 1024 }
  0x8b   : > { %v2321_v20 = vpack.c.bf16 %v530_v19, %v529_v18  ;;  %v515_v22 = vld [vmem:[#allocation8 + $0x8] sm:$0xff]  ;;  %v1936_v24 = vld [vmem:[%s3170_s2] ss:$0 sm:$0xff]  ;;  %v517_v35 = vld [vmem:[#allocation8 + $0x18] sm:$0xff]  ;;  %p2630_p10 = scmp.ne.s32.totalorder %s3120_s21, %s2629_s11  ;;  %s2712_s8 = smov [#allocation11]  }
  0x8c   : > { %v2325_v23 = vpack.c.bf16 %v515_v22, %v514_v21  ;;  %v516_v34 = vld [vmem:[#allocation8 + $0x10] sm:$0xff]  ;;  %v798_v44 = vld [vmem:[#allocation8 + $0x40] sm:$0xff]  ;;  %v799_v45 = vld [vmem:[#allocation8 + $0x48] sm:$0xff]  ;;  %s2633_s30 = sshll.u32 %s2712_s8, 4  ;;  %s2634_s30 = int_to_ptr.vmem [resolvable:$false] %s2633_s30 }
  0x8d   : > { %2316 = vmatpush3.bf16.msra.mxu1 %v2313_v6  ;;  %v2329_v40 = vpack.c.bf16 %v517_v35, %v516_v34  ;;  %v2333_v51 = vpack.c.bf16 %v799_v45, %v798_v44  ;;  %v800_v59 = vld [vmem:[#allocation8 + $0x50] sm:$0xff]  ;;  %v801_v60 = vld [vmem:[#allocation8 + $0x58] sm:$0xff]  ;;  %v1060_v22 = vld [vmem:[#allocation9 + $0x20] sm:$0xff]  ;;  %p2631_p3 = pnand %p2630_p10, %p2909_p5  ;;  %s2635_s9 = scalar_lea.vmem %s2634_s30, 2048 }
  0x8e   : > { %2318 = vmatprep.subr.bf16.mxu1 %v2317_v9  ;;  %v2337_v61 = vpack.c.bf16 %v801_v60, %v800_v59  ;;  %p2636_p12 = scmp.lt.s32.totalorder %s3120_s21, %s2634_s30  ;;  %p2637_p1 = scmp.lt.s32.totalorder %s2635_s9, %s2629_s11 }
  0x8f   : > { %p2632_p7 = pneg %p2631_p3 }
  0x90   : > { %2138 = vmatmul.mubr.msk.f32.vlgmr.msra.gmra.mrb[0].mxu1 %vm363_vm0, %v345_v10  ;;  %v1969_v10 = vld [vmem:[%s3172_s4] ss:$0 sm:$0xff]  ;;  %p2638_p2 = por %p2637_p1, %p2636_p12 }
  0x91   : > { %2140 = vmatprep.mubr.msk.f32.mxu1 %vm363_vm0, %v346_v11  ;;  %2320 = vmatpush3.bf16.msra.mxu1 %v2317_v9 }
  0x92   : > { %2322 = vmatprep.subr.bf16.mxu1 %v2321_v20  ;;  %p2639_p4 = pnand %p2638_p2, %p2632_p7 }
  0x94   : > { %2141 = vmatmul.mubr.msk.f32.gmra.mrb[2].mxu1 %vm363_vm0, %v347_v12 }
  0x95   : > { %2143 = vmatprep.mubr.msk.f32.mxu1 %vm363_vm0, %v348_v13  ;;  %2324 = vmatpush3.bf16.msra.mxu1 %v2321_v20 }
  0x96   : > { %2326 = vmatprep.subr.bf16.mxu1 %v2325_v23 }
  0x98   : > { %2144 = vmatmul.mubr.msk.f32.gmra.mrb[4].mxu1 %vm363_vm0, %v349_v14 }
  0x99   : > { %2146 = vmatprep.mubr.msk.f32.mxu1 %vm363_vm0, %v350_v15 }
  0x9c   : > { %2147 = vmatmul.mubr.msk.f32.gmra.mrb[6].mxu1 %vm363_vm0, %v351_v16 }
 0x163   : > { %v2139_v25 = vpop.f32.mrb[0].mxu1 }
 0x164   : > { %v460_v26 = vadd.f32 %v2139_v25, %v1936_v24  ;;  %v454_v27 = vpop.f32.mrb[1].mxu1 }
 0x165   : > { %v455_v28 = vadd.f32 %v1936_v24, %v454_v27 }
 0x166   : > { %499 = vst.msk [vmem:[#allocation2 + $0xa] sm:$0xff] %vm363_vm0, %v460_v26 }
 0x167   : > { %498 = vst.msk [vmem:[#allocation2 + $0x2] sm:$0xff] %vm363_vm0, %v455_v28  ;;  %v2142_v29 = vpop.f32.mrb[2].mxu1 }
 0x168   : > { %v470_v30 = vadd.f32 %v2142_v29, %v1936_v24  ;;  %v464_v31 = vpop.f32.mrb[3].mxu1 }
 0x169   : > { %v465_v32 = vadd.f32 %v1936_v24, %v464_v31 }
 0x16a   : > { %501 = vst.msk [vmem:[#allocation2 + $0x1a] sm:$0xff] %vm363_vm0, %v470_v30 }
 0x16b   : > { %500 = vst.msk [vmem:[#allocation2 + $0x12] sm:$0xff] %vm363_vm0, %v465_v32  ;;  %v2145_v33 = vpop.f32.mrb[4].mxu1  ;;  %v1062_v32 = vld [vmem:[#allocation9 + $0x30] sm:$0xff] }
 0x16c   : > { %v480_v36 = vadd.f32 %v2145_v33, %v1936_v24  ;;  %v474_v37 = vpop.f32.mrb[5].mxu1  ;;  %v1063_v33 = vld [vmem:[#allocation9 + $0x38] sm:$0xff] }
 0x16d   : > { %v475_v38 = vadd.f32 %v1936_v24, %v474_v37  ;;  %v519_v43 = vld [vmem:[#allocation2 + $0xa] sm:$0xff]  ;;  %v2345_v34 = vpack.c.bf16 %v1063_v33, %v1062_v32 }
 0x16e   : > { %503 = vst.msk [vmem:[#allocation2 + $0x32] sm:$0xff] %vm363_vm0, %v480_v36  ;;  %v518_v39 = vld [vmem:[#allocation2 + $0x2] sm:$0xff] }
 0x16f   : > { %v506_v41 = vld [vmem:[#allocation2 + $0x1] sm:$0xff]  ;;  %502 = vst.msk [vmem:[#allocation2 + $0x2a] sm:$0xff] %vm363_vm0, %v475_v38  ;;  %v2148_v42 = vpop.f32.mrb[6].mxu1  ;;  %2157 = vmatprep.mubr.msk.f32.mxu1 %vm363_vm0, %v518_v39  ;;  %v507_v62 = vld [vmem:[#allocation2 + $0x9] sm:$0xff]  ;;  %v1048_v39 = vld [vmem:[#allocation9 + $0x8] sm:$0xff] }
 0x170   : > { %1027 = vst.msk [vmem:[#allocation2] sm:$0x3] %vm1026_vm2, %v2711_v17  ;;  %v490_v46 = vadd.f32 %v2148_v42, %v1936_v24  ;;  %v484_v47 = vpop.f32.mrb[7].mxu1  ;;  %2158 = vmatmul.mubr.msk.f32.vlgmr.msra.gmra.mrb[8].mxu1 %vm363_vm0, %v519_v43  ;;  %v789_v4 = vld [vmem:[#allocation2 + $0x3] sm:$0xff]  ;;  %v1047_v38 = vld [vmem:[#allocation9] sm:$0xff] }
 0x171   : > { %v485_v48 = vadd.f32 %v1936_v24, %v484_v47  ;;  %2328 = vmatpush3.bf16.msra.mxu1 %v2325_v23  ;;  %v792_v49 = vld [vmem:[#allocation2 + $0x1b] sm:$0xff]  ;;  %v2349_v42 = vpack.c.bf16 %v1048_v39, %v1047_v38 }
 0x172   : > { %505 = vst.msk [vmem:[#allocation2 + $0x42] sm:$0xff] %vm363_vm0, %v490_v46  ;;  %v520_v50 = vld [vmem:[#allocation2 + $0x12] sm:$0xff]  ;;  %2330 = vmatprep.subr.bf16.mxu1 %v2329_v40  ;;  %v521_v52 = vld [vmem:[#allocation2 + $0x1a] sm:$0xff] }
 0x173   : > { %1029 = vst.msk [vmem:[#allocation2 + $0x22] sm:$0x3] %vm1026_vm2, %v2711_v17  ;;  %2160 = vmatprep.mubr.msk.f32.mxu1 %vm363_vm0, %v520_v50  ;;  %v508_v63 = vld [vmem:[#allocation2 + $0x11] sm:$0xff]  ;;  %v509_v0 = vld [vmem:[#allocation2 + $0x19] sm:$0xff]  ;;  %v1050_v50 = vld [vmem:[#allocation9 + $0x18] sm:$0xff] }
 0x174   : > { %504 = vst.msk [vmem:[#allocation2 + $0x3a] sm:$0xff] %vm363_vm0, %v485_v48  ;;  %2161 = vmatmul.mubr.msk.f32.gmra.mrb[10].mxu1 %vm363_vm0, %v521_v52  ;;  %v790_v5 = vld [vmem:[#allocation2 + $0xb] sm:$0xff]  ;;  %v791_v6 = vld [vmem:[#allocation2 + $0x13] sm:$0xff] }
 0x175   : > { %2332 = vmatpush3.bf16.msra.mxu1 %v2329_v40  ;;  %v523_v55 = vld [vmem:[#allocation2 + $0x32] sm:$0xff] }
 0x176   : > { %v522_v53 = vld [vmem:[#allocation2 + $0x2a] sm:$0xff]  ;;  %2334 = vmatprep.subr.bf16.mxu1 %v2333_v51  ;;  %v1061_v23 = vld [vmem:[#allocation9 + $0x28] sm:$0xff] }
 0x177   : > { %v510_v54 = vld [vmem:[#allocation2 + $0x29] sm:$0xff]  ;;  %2163 = vmatprep.mubr.msk.f32.mxu1 %vm363_vm0, %v522_v53  ;;  %v511_v1 = vld [vmem:[#allocation2 + $0x31] sm:$0xff]  ;;  %v2341_v25 = vpack.c.bf16 %v1061_v23, %v1060_v22 }
 0x178   : > { %1028 = vst.msk [vmem:[#allocation2 + $0x28] sm:$0x3] %vm1026_vm2, %v2711_v17  ;;  %2164 = vmatmul.mubr.msk.f32.gmra.mrb[12].mxu1 %vm363_vm0, %v523_v55  ;;  %v793_v7 = vld [vmem:[#allocation2 + $0x2b] sm:$0xff]  ;;  %v1632_v22 = vld [vmem:[#allocation9 + $0x88] sm:$0xff] }
 0x179   : > { %v796_v56 = vld [vmem:[#allocation2 + $0x43] sm:$0xff]  ;;  %2342 = vmatprep.subr.bf16.mxu0 %v2341_v25  ;;  %v1331_v55 = vld [vmem:[#allocation9 + $0x40] sm:$0xff] }
 0x17a   : > { %1030 = vst.msk [vmem:[#allocation2 + $0x4a] sm:$0x3] %vm1026_vm2, %v2711_v17  ;;  %v525_v58 = vld [vmem:[#allocation2 + $0x42] sm:$0xff]  ;;  %2344 = vmatpush3.bf16.msra.mxu0 %v2341_v25 }
 0x17b   : > { %v524_v57 = vld [vmem:[#allocation2 + $0x3a] sm:$0xff]  ;;  %2346 = vmatprep.subr.bf16.mxu0 %v2345_v34 }
 0x17c   : > { %2166 = vmatprep.mubr.msk.f32.mxu1 %vm363_vm0, %v524_v57  ;;  %v512_v2 = vld [vmem:[#allocation2 + $0x39] sm:$0xff]  ;;  %v513_v3 = vld [vmem:[#allocation2 + $0x41] sm:$0xff] }
 0x17d   : > { %2167 = vmatmul.mubr.msk.f32.gmra.mrb[14].mxu1 %vm363_vm0, %v525_v58  ;;  %v794_v8 = vld [vmem:[#allocation2 + $0x33] sm:$0xff]  ;;  %v795_v9 = vld [vmem:[#allocation2 + $0x3b] sm:$0xff] }
 0x17e   : > { %2177 = vmatprep.mubr.msk.f32.mxu1 %vm363_vm0, %v506_v41  ;;  %2348 = vmatpush3.bf16.msra.mxu0 %v2345_v34 }
 0x17f   : > { %2350 = vmatprep.subr.bf16.mxu0 %v2349_v42 }
 0x181   : > { %2178 = vmatmul.mubr.msk.f32.vlgmr.msra.gmra.mrb[8].mxu1 %vm363_vm0, %v507_v62 }
 0x182   : > { %2336 = vmatpush3.bf16.msra.mxu1 %v2333_v51  ;;  %2180 = vmatprep.mubr.msk.f32.mxu1 %vm363_vm0, %v508_v63 }
 0x183   : > { %2338 = vmatprep.subr.bf16.mxu1 %v2337_v61 }
 0x185   : > { %2181 = vmatmul.mubr.msk.f32.gmra.mrb[10].mxu1 %vm363_vm0, %v509_v0 }
 0x186   : > { %2183 = vmatprep.mubr.msk.f32.mxu1 %vm363_vm0, %v510_v54  ;;  %2340 = vmatpush3.bf16.msra.mxu1 %v2337_v61  ;;  %v1333_v61 = vld [vmem:[#allocation9 + $0x50] sm:$0xff] }
 0x187   : > { %2381 = vmatprep.subr.bf16.mxu1 %v2341_v25 }
 0x189   : > { %2184 = vmatmul.mubr.msk.f32.gmra.mrb[12].mxu1 %vm363_vm0, %v511_v1  ;;  %v1334_v1 = vld [vmem:[#allocation9 + $0x58] sm:$0xff] }
 0x18a   : > { %2186 = vmatprep.mubr.msk.f32.mxu1 %vm363_vm0, %v512_v2 }
 0x18d   : > { %2187 = vmatmul.mubr.msk.f32.gmra.mrb[14].mxu1 %vm363_vm0, %v513_v3  ;;  %v2361_v3 = vpack.c.bf16 %v1334_v1, %v1333_v61 }
 0x18e   : > { %2197 = vmatprep.mubr.msk.f32.mxu1 %vm363_vm0, %v789_v4  ;;  %v1481_v4 = vld [vmem:[#allocation9 + $0x60] sm:$0xff] }
 0x191   : > { %2198 = vmatmul.mubr.msk.f32.vlgmr.msra.gmra.mrb[8].mxu1 %vm363_vm0, %v790_v5 }
 0x192   : > { %2200 = vmatprep.mubr.msk.f32.mxu1 %vm363_vm0, %v791_v6  ;;  %2383 = vmatpush3.bf16.msra.mxu1 %v2341_v25 }
 0x193   : > { %2382 = vmatprep.subr.bf16.mxu1 %v2345_v34 }
 0x195   : > { %2201 = vmatmul.mubr.msk.f32.gmra.mrb[10].mxu1 %vm363_vm0, %v792_v49  ;;  %v1049_v49 = vld [vmem:[#allocation9 + $0x10] sm:$0xff] }
 0x196   : > { %2203 = vmatprep.mubr.msk.f32.mxu1 %vm363_vm0, %v793_v7  ;;  %2384 = vmatpush3.bf16.msra.mxu1 %v2345_v34  ;;  %v2353_v51 = vpack.c.bf16 %v1050_v50, %v1049_v49  ;;  %v1482_v7 = vld [vmem:[#allocation9 + $0x68] sm:$0xff] }
 0x199   : > { %2204 = vmatmul.mubr.msk.f32.gmra.mrb[12].mxu1 %vm363_vm0, %v794_v8 }
 0x19a   : > { %2206 = vmatprep.mubr.msk.f32.mxu1 %vm363_vm0, %v795_v9  ;;  %v2365_v9 = vpack.c.bf16 %v1482_v7, %v1481_v4 }
 0x19d   : > { %2207 = vmatmul.mubr.msk.f32.gmra.mrb[14].mxu1 %vm363_vm0, %v796_v56  ;;  %v1332_v56 = vld [vmem:[#allocation9 + $0x48] sm:$0xff] }
 0x19e   : > { %v2357_v57 = vpack.c.bf16 %v1332_v56, %v1331_v55 }
 0x264   : > { %v2199_v11 = vpop.f32.mrb[8].mxu1 }
 0x265   : > { %v892_v12 = vpop.f32.mrb[9].mxu1  ;;  %v947_v14 = vadd.f32 %v2199_v11, %v1969_v10 }
 0x266   : > { %v946_v13 = vadd.f32 %v1969_v10, %v892_v12 }
 0x267   : > { %v955_v18 = vmax.f32 %v947_v14, 0.0 }
 0x268   : > { %v2202_v15 = vpop.f32.mrb[10].mxu1  ;;  %v954_v16 = vmax.f32 %v946_v13, 0.0 }
 0x269   : > { %v902_v17 = vpop.f32.mrb[11].mxu1  ;;  %v949_v26 = vadd.f32 %v2202_v15, %v1969_v10 }
 0x26a   : > { %962 = vxpose.xlu0.b32.start [1/4] (short) (narrow) %v954_v16, 32  ;;  %v948_v19 = vadd.f32 %v1969_v10, %v902_v17  ;;  %v1483_v16 = vld [vmem:[#allocation9 + $0x70] sm:$0xff]  ;;  %v1484_v17 = vld [vmem:[#allocation9 + $0x78] sm:$0xff] }
 0x26b   : > { %v957_v35 = vmax.f32 %v949_v26, 0.0 }
 0x26c   : > { %v2205_v20 = vpop.f32.mrb[12].mxu1  ;;  %v956_v27 = vmax.f32 %v948_v19, 0.0  ;;  %v2369_v19 = vpack.c.bf16 %v1484_v17, %v1483_v16 }
 0x26d   : > { %v912_v21 = vpop.f32.mrb[13].mxu1  ;;  %v951_v28 = vadd.f32 %v2205_v20, %v1969_v10 }
 0x26e   : > { %963 = vxpose.xlu0.b32.cont [2/4] (short) (narrow) %v955_v18, 32  ;;  %v950_v24 = vadd.f32 %v1969_v10, %v912_v21  ;;  %v1631_v21 = vld [vmem:[#allocation9 + $0x80] sm:$0xff] }
 0x26f   : > { %v959_v36 = vmax.f32 %v951_v28, 0.0 }
 0x270   : > { %v2208_v29 = vpop.f32.mrb[14].mxu1  ;;  %v958_v30 = vmax.f32 %v950_v24, 0.0  ;;  %v2373_v24 = vpack.c.bf16 %v1632_v22, %v1631_v21 }
 0x271   : > { %v922_v31 = vpop.f32.mrb[15].mxu1  ;;  %v953_v40 = vadd.f32 %v2208_v29, %v1969_v10 }
 0x272   : > { %964 = vxpose.xlu0.b32.cont [3/4] (short) (narrow) %v956_v27, 32  ;;  %994 = vxpose.xlu1.b32.start [1/4] (short) (narrow) %v958_v30, 32  ;;  %v952_v37 = vadd.f32 %v1969_v10, %v922_v31  ;;  %v1633_v30 = vld [vmem:[#allocation9 + $0x90] sm:$0xff]  ;;  %v1634_v31 = vld [vmem:[#allocation9 + $0x98] sm:$0xff] }
 0x273   : > { %v961_v43 = vmax.f32 %v953_v40, 0.0  ;;  %v2377_v33 = vpack.c.bf16 %v1634_v31, %v1633_v30 }
 0x274   : > { %v960_v41 = vmax.f32 %v952_v37, 0.0 }
 0x276   : > { %965 = vxpose.xlu0.b32.end [4/4] (short) (narrow) %v957_v35, 32  ;;  %995 = vxpose.xlu1.b32.cont [2/4] (short) (narrow) %v959_v36, 32 }
 0x27a   : > { %996 = vxpose.xlu1.b32.cont [3/4] (short) (narrow) %v960_v41, 32 }
 0x27e   : > { %997 = vxpose.xlu1.b32.end [4/4] (short) (narrow) %v961_v43, 32 }
 0x2ea   : > { %v978_v44 = vpop.trf.xlu0 }
 0x2eb   : > { %1031 = vst.msk [vmem:[#allocation2 + $0x2] sm:$0xff] %vm363_vm0, %v978_v44 }
 0x2ee   : > { %v979_v45 = vpop.trf.xlu0 }
 0x2ef   : > { %1032 = vst.msk [vmem:[#allocation2 + $0xa] sm:$0xff] %vm363_vm0, %v979_v45 }
 0x2f2   : > { %v980_v46 = vpop.trf.xlu0  ;;  %v1051_v47 = vld [vmem:[#allocation2 + $0x1] sm:$0xff]  ;;  %v1010_v48 = vpop.trf.xlu1 }
 0x2f3   : > { %1033 = vst.msk [vmem:[#allocation2 + $0x12] sm:$0xff] %vm363_vm0, %v980_v46  ;;  %2217 = vmatprep.mubr.msk.f32.mxu0 %vm363_vm0, %v1051_v47  ;;  %1035 = vst.msk [vmem:[#allocation2 + $0x2a] sm:$0xff] %vm363_vm0, %v1010_v48  ;;  %v1039_v2 = vld [vmem:[#allocation2] sm:$0xff] }
 0x2f4   : > { %v1322_v18 = vld [vmem:[#allocation2 + $0x2] sm:$0xff] }
 0x2f6   : > { %v981_v52 = vpop.trf.xlu0  ;;  %v1052_v53 = vld [vmem:[#allocation2 + $0x9] sm:$0xff]  ;;  %v1011_v54 = vpop.trf.xlu1 }
 0x2f7   : > { %1034 = vst.msk [vmem:[#allocation2 + $0x1a] sm:$0xff] %vm363_vm0, %v981_v52  ;;  %2218 = vmatmul.mubr.msk.f32.vlgmr.msra.gmra.mrb[0].mxu0 %vm363_vm0, %v1052_v53  ;;  %1036 = vst.msk [vmem:[#allocation2 + $0x32] sm:$0xff] %vm363_vm0, %v1011_v54  ;;  %v1040_v5 = vld [vmem:[#allocation2 + $0x8] sm:$0xff]  ;;  %v2010_v53 = vld [vmem:[%s3174_s6] ss:$0 sm:$0xff] }
 0x2f8   : > { %2352 = vmatpush3.bf16.msra.mxu0 %v2349_v42  ;;  %v1323_v20 = vld [vmem:[#allocation2 + $0xa] sm:$0xff] }
 0x2f9   : > { %2354 = vmatprep.subr.bf16.mxu0 %v2353_v51  ;;  %v1472_v32 = vld [vmem:[#allocation2 + $0x3] sm:$0xff] }
 0x2fa   : > { %v1053_v58 = vld [vmem:[#allocation2 + $0x11] sm:$0xff]  ;;  %v1012_v59 = vpop.trf.xlu1  ;;  %v1055_v60 = vld [vmem:[#allocation2 + $0x29] sm:$0xff] }
 0x2fb   : > { %2220 = vmatprep.mubr.msk.f32.mxu0 %vm363_vm0, %v1053_v58  ;;  %1037 = vst.msk [vmem:[#allocation2 + $0x3a] sm:$0xff] %vm363_vm0, %v1012_v59  ;;  %2223 = vmatprep.mubr.msk.f32.mxu1 %vm363_vm0, %v1055_v60  ;;  %v1041_v8 = vld [vmem:[#allocation2 + $0x10] sm:$0xff]  ;;  %v1043_v12 = vld [vmem:[#allocation2 + $0x28] sm:$0xff] }
 0x2fc   : > { %2356 = vmatpush3.bf16.msra.mxu0 %v2353_v51  ;;  %v1324_v23 = vld [vmem:[#allocation2 + $0x12] sm:$0xff]  ;;  %v1326_v26 = vld [vmem:[#allocation2 + $0x2a] sm:$0xff] }
 0x2fd   : > { %2358 = vmatprep.subr.bf16.mxu0 %v2357_v57  ;;  %v1473_v34 = vld [vmem:[#allocation2 + $0xb] sm:$0xff] }
 0x2fe   : > { %v1054_v62 = vld [vmem:[#allocation2 + $0x19] sm:$0xff]  ;;  %v1013_v63 = vpop.trf.xlu1  ;;  %v1056_v0 = vld [vmem:[#allocation2 + $0x31] sm:$0xff]  ;;  %v1622_v41 = vld [vmem:[#allocation2 + $0x4] sm:$0xff] }
 0x2ff   : > { %2221 = vmatmul.mubr.msk.f32.gmra.mrb[2].mxu0 %vm363_vm0, %v1054_v62  ;;  %1038 = vst.msk [vmem:[#allocation2 + $0x42] sm:$0xff] %vm363_vm0, %v1013_v63  ;;  %2224 = vmatmul.mubr.msk.f32.vlgmr.msra.gmra.mrb[16].mxu1 %vm363_vm0, %v1056_v0  ;;  %v1042_v10 = vld [vmem:[#allocation2 + $0x18] sm:$0xff]  ;;  %v1044_v13 = vld [vmem:[#allocation2 + $0x30] sm:$0xff] }
 0x300   : > { %2237 = vmatprep.mubr.msk.f32.mxu0 %vm363_vm0, %v1039_v2  ;;  %v1325_v25 = vld [vmem:[#allocation2 + $0x1a] sm:$0xff]  ;;  %v1327_v27 = vld [vmem:[#allocation2 + $0x32] sm:$0xff] }
 0x301   : > { %v1474_v35 = vld [vmem:[#allocation2 + $0x13] sm:$0xff]  ;;  %v1475_v36 = vld [vmem:[#allocation2 + $0x1b] sm:$0xff]  ;;  %v1476_v37 = vld [vmem:[#allocation2 + $0x2b] sm:$0xff] }
 0x302   : > { %v1057_v6 = vld [vmem:[#allocation2 + $0x39] sm:$0xff]  ;;  %v1623_v42 = vld [vmem:[#allocation2 + $0xc] sm:$0xff] }
 0x303   : > { %2238 = vmatmul.mubr.msk.f32.vlgmr.msra.gmra.mrb[0].mxu0 %vm363_vm0, %v1040_v5  ;;  %2226 = vmatprep.mubr.msk.f32.mxu1 %vm363_vm0, %v1057_v6  ;;  %v1045_v14 = vld [vmem:[#allocation2 + $0x38] sm:$0xff]  ;;  %v1626_v45 = vld [vmem:[#allocation2 + $0x2c] sm:$0xff] }
 0x304   : > { %2360 = vmatpush3.bf16.msra.mxu0 %v2357_v57  ;;  %2240 = vmatprep.mubr.msk.f32.mxu0 %vm363_vm0, %v1041_v8  ;;  %v1328_v28 = vld [vmem:[#allocation2 + $0x3a] sm:$0xff] }
 0x305   : > { %2362 = vmatprep.subr.bf16.mxu0 %v2361_v3  ;;  %v1477_v38 = vld [vmem:[#allocation2 + $0x33] sm:$0xff]  ;;  %v1625_v44 = vld [vmem:[#allocation2 + $0x1c] sm:$0xff] }
 0x306   : > { %v1058_v11 = vld [vmem:[#allocation2 + $0x41] sm:$0xff]  ;;  %v1624_v43 = vld [vmem:[#allocation2 + $0x14] sm:$0xff] }
 0x307   : > { %2241 = vmatmul.mubr.msk.f32.gmra.mrb[2].mxu0 %vm363_vm0, %v1042_v10  ;;  %2227 = vmatmul.mubr.msk.f32.gmra.mrb[18].mxu1 %vm363_vm0, %v1058_v11  ;;  %v1046_v15 = vld [vmem:[#allocation2 + $0x40] sm:$0xff]  ;;  %v1627_v46 = vld [vmem:[#allocation2 + $0x34] sm:$0xff] }
 0x308   : > { %2243 = vmatprep.mubr.msk.f32.mxu0 %vm363_vm0, %v1043_v12  ;;  %2364 = vmatpush3.bf16.msra.mxu0 %v2361_v3  ;;  %v1329_v29 = vld [vmem:[#allocation2 + $0x42] sm:$0xff] }
 0x309   : > { %2366 = vmatprep.subr.bf16.mxu0 %v2365_v9  ;;  %v1478_v39 = vld [vmem:[#allocation2 + $0x3b] sm:$0xff]  ;;  %v1479_v40 = vld [vmem:[#allocation2 + $0x43] sm:$0xff] }
 0x30a   : > { %v1628_v47 = vld [vmem:[#allocation2 + $0x3c] sm:$0xff]  ;;  %v1629_v48 = vld [vmem:[#allocation2 + $0x44] sm:$0xff] }
 0x30b   : > { %2244 = vmatmul.mubr.msk.f32.gmra.mrb[4].mxu0 %vm363_vm0, %v1044_v13 }
 0x30c   : > { %2246 = vmatprep.mubr.msk.f32.mxu0 %vm363_vm0, %v1045_v14 }
 0x30f   : > { %2247 = vmatmul.mubr.msk.f32.gmra.mrb[6].mxu0 %vm363_vm0, %v1046_v15 }
 0x310   : > { %2257 = vmatprep.mubr.msk.f32.mxu0 %vm363_vm0, %v1322_v18 }
 0x313   : > { %2258 = vmatmul.mubr.msk.f32.vlgmr.msra.gmra.mrb[0].mxu0 %vm363_vm0, %v1323_v20 }
 0x314   : > { %2368 = vmatpush3.bf16.msra.mxu0 %v2365_v9  ;;  %2260 = vmatprep.mubr.msk.f32.mxu0 %vm363_vm0, %v1324_v23 }
 0x315   : > { %2370 = vmatprep.subr.bf16.mxu0 %v2369_v19 }
 0x317   : > { %2261 = vmatmul.mubr.msk.f32.gmra.mrb[2].mxu0 %vm363_vm0, %v1325_v25 }
 0x318   : > { %2263 = vmatprep.mubr.msk.f32.mxu0 %vm363_vm0, %v1326_v26  ;;  %2372 = vmatpush3.bf16.msra.mxu0 %v2369_v19 }
 0x319   : > { %2374 = vmatprep.subr.bf16.mxu0 %v2373_v24 }
 0x31b   : > { %2264 = vmatmul.mubr.msk.f32.gmra.mrb[4].mxu0 %vm363_vm0, %v1327_v27 }
 0x31c   : > { %2266 = vmatprep.mubr.msk.f32.mxu0 %vm363_vm0, %v1328_v28 }
 0x31f   : > { %2267 = vmatmul.mubr.msk.f32.gmra.mrb[6].mxu0 %vm363_vm0, %v1329_v29 }
 0x320   : > { %2277 = vmatprep.mubr.msk.f32.mxu0 %vm363_vm0, %v1472_v32 }
 0x323   : > { %2278 = vmatmul.mubr.msk.f32.vlgmr.msra.gmra.mrb[0].mxu0 %vm363_vm0, %v1473_v34 }
 0x324   : > { %2376 = vmatpush3.bf16.msra.mxu0 %v2373_v24  ;;  %2280 = vmatprep.mubr.msk.f32.mxu0 %vm363_vm0, %v1474_v35 }
 0x325   : > { %2378 = vmatprep.subr.bf16.mxu0 %v2377_v33 }
 0x327   : > { %2281 = vmatmul.mubr.msk.f32.gmra.mrb[2].mxu0 %vm363_vm0, %v1475_v36 }
 0x328   : > { %2283 = vmatprep.mubr.msk.f32.mxu0 %vm363_vm0, %v1476_v37  ;;  %2380 = vmatpush3.bf16.msra.mxu0 %v2377_v33 }
 0x32b   : > { %2284 = vmatmul.mubr.msk.f32.gmra.mrb[4].mxu0 %vm363_vm0, %v1477_v38 }
 0x32c   : > { %2286 = vmatprep.mubr.msk.f32.mxu0 %vm363_vm0, %v1478_v39 }
 0x32f   : > { %2287 = vmatmul.mubr.msk.f32.gmra.mrb[6].mxu0 %vm363_vm0, %v1479_v40 }
 0x330   : > { %2297 = vmatprep.mubr.msk.f32.mxu0 %vm363_vm0, %v1622_v41 }
 0x333   : > { %2298 = vmatmul.mubr.msk.f32.vlgmr.msra.gmra.mrb[0].mxu0 %vm363_vm0, %v1623_v42 }
 0x334   : > { %2300 = vmatprep.mubr.msk.f32.mxu0 %vm363_vm0, %v1624_v43 }
 0x337   : > { %2301 = vmatmul.mubr.msk.f32.gmra.mrb[2].mxu0 %vm363_vm0, %v1625_v44 }
 0x338   : > { %2303 = vmatprep.mubr.msk.f32.mxu0 %vm363_vm0, %v1626_v45 }
 0x33b   : > { %2304 = vmatmul.mubr.msk.f32.gmra.mrb[4].mxu0 %vm363_vm0, %v1627_v46 }
 0x33c   : > { %2306 = vmatprep.mubr.msk.f32.mxu0 %vm363_vm0, %v1628_v47 }
 0x33f   : > { %2307 = vmatmul.mubr.msk.f32.gmra.mrb[6].mxu0 %vm363_vm0, %v1629_v48 }
 0x3d2   : > { %v2225_v49 = vpop.f32.mrb[16].mxu1 }
 0x3d3   : > { %v1174_v50 = vpop.f32.mrb[17].mxu1 }
 0x3da   : > { %v2228_v51 = vpop.f32.mrb[18].mxu1 }
 0x3db   : > { %v1184_v52 = vpop.f32.mrb[19].mxu1 }
 0x406   : > { %v2299_v54 = vpop.f32.mrb[0].mxu0 }
 0x407   : > { %v1780_v55 = vadd.f32 %v2299_v54, %v2010_v53  ;;  %v1725_v56 = vpop.f32.mrb[1].mxu0 }
 0x408   : > { %v1779_v57 = vadd.f32 %v2010_v53, %v1725_v56 }
 0x409   : > { %v1788_v58 = vmax.f32 %v1780_v55, 0.0 }
 0x40a   : > { %v1787_v59 = vmax.f32 %v1779_v57, 0.0  ;;  %v2302_v60 = vpop.f32.mrb[2].mxu0 }
 0x40b   : > { %1796 = vst.msk [vmem:[%s3099_s12 + $0x8] sm:$0xff] %vm363_vm0, %v1788_v58  ;;  %v1782_v61 = vadd.f32 %v2302_v60, %v2010_v53  ;;  %v1735_v62 = vpop.f32.mrb[3].mxu0 }
 0x40c   : > { %1795 = vst.msk [vmem:[%s3099_s12] sm:$0xff] %vm363_vm0, %v1787_v59  ;;  %v1781_v63 = vadd.f32 %v2010_v53, %v1735_v62 }
 0x40d   : > { %v1790_v0 = vmax.f32 %v1782_v61, 0.0 }
 0x40e   : > { %v1789_v1 = vmax.f32 %v1781_v63, 0.0  ;;  %v2305_v2 = vpop.f32.mrb[4].mxu0 }
 0x40f   : > { %1798 = vst.msk [vmem:[%s3099_s12 + $0x18] sm:$0xff] %vm363_vm0, %v1790_v0  ;;  %v2385_v3 = vadd.f32 %v2305_v2, %v2225_v49  ;;  %v1745_v4 = vpop.f32.mrb[5].mxu0 }
 0x410   : > { %1797 = vst.msk [vmem:[%s3099_s12 + $0x10] sm:$0xff] %vm363_vm0, %v1789_v1  ;;  %v2386_v5 = vadd.f32 %v1745_v4, %v1174_v50 }
 0x411   : > { %v1784_v6 = vadd.f32 %v2385_v3, %v2010_v53 }
 0x412   : > { %v1783_v7 = vadd.f32 %v2386_v5, %v2010_v53  ;;  %v2308_v8 = vpop.f32.mrb[6].mxu0 }
 0x413   : > { %v1792_v9 = vmax.f32 %v1784_v6, 0.0  ;;  %v2387_v10 = vadd.f32 %v2308_v8, %v2228_v51  ;;  %v1755_v11 = vpop.f32.mrb[7].mxu0 }
 0x414   : > { %v1791_v12 = vmax.f32 %v1783_v7, 0.0  ;;  %v2388_v13 = vadd.f32 %v1755_v11, %v1184_v52 }
 0x415   : > { %1800 = vst.msk [vmem:[%s3099_s12 + $0x28] sm:$0xff] %vm363_vm0, %v1792_v9  ;;  %v1786_v14 = vadd.f32 %v2387_v10, %v2010_v53 }
 0x416   : > { %1799 = vst.msk [vmem:[%s3099_s12 + $0x20] sm:$0xff] %vm363_vm0, %v1791_v12  ;;  %v1785_v15 = vadd.f32 %v2388_v13, %v2010_v53 }
 0x417   : > { %v1794_v16 = vmax.f32 %v1786_v14, 0.0 }
 0x418   : > { %v1793_v17 = vmax.f32 %v1785_v15, 0.0 }
 0x419   : > { %1802 = vst.msk [vmem:[%s3099_s12 + $0x38] sm:$0xff] %vm363_vm0, %v1794_v16 }
 0x41a   : > { %1801 = vst.msk [vmem:[%s3099_s12 + $0x30] sm:$0xff] %vm363_vm0, %v1793_v17 }
 0x41b   : > { %2642 = shalt.err (!%p2639_p4)
}
 0x41c   : > { %s2643_s13 = scalar_lea.hbm %s3118_s23, 1024  ;;  %s2647_s14 = scalar_lea.hbm %s3175_s7, 2048 }
 0x41d   : > { %p2644_p9 = scmp.ne.s32.totalorder %s3118_s23, %s2643_s13  ;;  %p2648_p8 = scmp.lt.u32.totalorder %s3118_s23, %s3175_s7 }
 0x41e   : > { %p2649_p13 = scmp.lt.u32.totalorder %s2647_s14, %s2643_s13  ;;  %p2651_p10 = scmp.lt.u32.totalorder %s2643_s13, %s3118_s23 }
 0x41f   : > { %p2645_p0 = pnand %p2644_p9, %p2909_p5 }
 0x420   : > { %p2650_p6 = por %p2649_p13, %p2648_p8 }
 0x421   : > { %p2646_p11 = pneg %p2645_p0 }
 0x422   : > { %p2652_p3 = por %p2651_p10, %p2650_p6 }
 0x424   : > { %p2653_p7 = pnand %p2652_p3, %p2646_p11 }
 0x426   : > { %2656 = shalt.err (!%p2653_p7)
}
 0x427   : > { %s2713_s16 = smov 128   ;;  %s2714_s29 = smov 8  }
 0x428   : > { %2447 = dma.vmem_to_hbm [thread:$0]  (%p2909_p5), %s3120_s21, 1024, %s3118_s23, %s1804_s28, %s2713_s16, %s2713_s16, %s2714_s29  }
 0x429 PF: > { %s3195_s11 = sld [smem:[#allocation16_spill]]  ;;  %s1833_s8 = sand.u32 1, %s2691_s24  }
 0x42a   : > { %p3197_p1 = scmp.ge.s32.totalorder %s2703_s27, 2  ;;  %s1834_s30 = scalar_lea.sflag [#allocation5], %s1833_s8 }
 0x42f   : > { %p3196_p12 = scmp.ne.s32.totalorder %s3195_s11, 0 }
 0x431   : > { %p2464_p2 = pnand %p3197_p1, %p3196_p12 }
 0x433   : > { %2686 = dma.done.wait (!%p2464_p2), %s1834_s30, 1024  }
 0x434   : > { %2688 = vsyncadd (!%p2464_p2), %s1834_s30, 4294966272  ;;  %p22_p4 = scmp.ge.s32.totalorder %s2895_s22, 4   ;;  %s3198_s24 = smov %s2695_s25 }
 0x435   : > { %s3199_s25 = smov %s2699_s26  ;;  %s3200_s26 = smov %s2905_s18 }
 0x436   : > { %s3201_s27 = smov %s2895_s22  ;;  %24 = sbr.rel (!%p22_p4) target bundleno = 7 (0x7), region = 111 }
 0x43d   :  { %1839 = vsyncpa [#allocation4], 1 }
 0x43e   :  { %1841 = vsyncpa [#allocation4 + $0x1], 1 }
 0x43f   :  { %1842 = vsyncpa [#allocation7], 1 }
 0x440   :  { %1843 = vsyncpa [#allocation10], 1 }
 0x441   :  { %1844 = vsyncpa [#allocation5], 1 }
 0x442   :  { %1846 = vsyncpa [#allocation5 + $0x1], 1 }

</bundles_post_ra>
